<compile_context>
chip_gen: v6e
topology: v6e:2x2x1
jax: 0.10.0
libtpu: 0.0.40
codegen_flags: <defaults>
</compile_context>

<pallas_src>
import jax
import jax.numpy as jnp
from jax.experimental import pallas as pl
from jax.experimental.pallas import tpu as pltpu

# ----- model hyper-parameters (task='phenotyping', ViT backbone, 2 image mods, with_text=True)
VISION_EMBED_DIM = 768
TEXT_EMBED_DIM = 768
N_IMG_MODALITIES = 2
WITH_TEXT = True
PROJECTION_DIM = 512
NUM_CLASSES = 25                 # phenotyping
NUM_CLASSES_PAD = 128            # lane-dense padded classifier width

PROJ_IN_DIM = VISION_EMBED_DIM * N_IMG_MODALITIES + (TEXT_EMBED_DIM if WITH_TEXT else 0)
TK = 768                         # K tile == one modality's embedding width


def fusion_head_kernel(x_ref, wp_ref, wc_ref, bc_ref, out_ref, acc_ref):
    """Pipelined projection (K-reduction) -> tanh -> classifier.

    x_ref : (B, TK)        bf16   current K-slice of concatenated embeddings
    wp_ref: (TK, P)        bf16   current K-slice of projection weight
    wc_ref: (P, Cp)        bf16   classifier weight (padded to 128 lanes, resident)
    bc_ref: (1, Cp)        f32    classifier bias (padded)
    out   : (B, Cp)        f32    padded logits (written on last K step)
    acc   : (B, P)         f32    VMEM scratch accumulator
    """
    k = pl.program_id(0)

    @pl.when(k == 0)
    def _():
        acc_ref[...] = jnp.zeros_like(acc_ref)

    # dropout(0.1) before projection -> identity in eval mode
    acc_ref[...] += jnp.dot(
        x_ref[...], wp_ref[...], preferred_element_type=jnp.float32
    )

    @pl.when(k == pl.num_programs(0) - 1)
    def _():
        h = jnp.tanh(acc_ref[...]).astype(wc_ref.dtype)   # bf16 into the MXU
        # second dropout -> identity in eval mode
        out_ref[...] = (
            jnp.dot(h, wc_ref[...], preferred_element_type=jnp.float32) + bc_ref[...]
        )


def multimodal_head(vl_embeds, w_proj, w_cls_pad, b_cls_pad):
    """vl_embeds (B, Din) bf16; w_proj (Din, P) bf16; w_cls_pad (P, Cp) bf16; b_cls_pad (1, Cp) f32."""
    B, Din = vl_embeds.shape
    P = w_proj.shape[1]
    Cp = w_cls_pad.shape[1]
    assert Din % TK == 0
    n_k = Din // TK

    return pl.pallas_call(
        fusion_head_kernel,
        out_shape=jax.ShapeDtypeStruct((B, Cp), jnp.float32),
        grid_spec=pltpu.PrefetchScalarGridSpec(
            num_scalar_prefetch=0,
            grid=(n_k,),
            in_specs=[
                pl.BlockSpec((B, TK), lambda k: (0, k)),    # x K-slice
                pl.BlockSpec((TK, P), lambda k: (k, 0)),    # Wp K-slice (pipelined DMA)
                pl.BlockSpec((P, Cp), lambda k: (0, 0)),    # Wc resident (constant block)
                pl.BlockSpec((1, Cp), lambda k: (0, 0)),    # bias resident
            ],
            out_specs=pl.BlockSpec((B, Cp), lambda k: (0, 0)),
            scratch_shapes=[pltpu.VMEM((B, P), jnp.float32)],
        ),
        compiler_params=pltpu.CompilerParams(
            dimension_semantics=("arbitrary",),   # K is a reduction axis
        ),
    )(vl_embeds, w_proj, w_cls_pad, b_cls_pad)


def multimodal_transformer_forward(image_embeds_list, text_embeds, params):
    """Glue: concat modality embeddings (torch.cat, dim=1) + fused head kernel."""
    embeds = list(image_embeds_list)
    if WITH_TEXT:
        embeds.append(text_embeds)
    vl_embeds = jnp.concatenate(embeds, axis=1).astype(jnp.bfloat16)  # (B, PROJ_IN_DIM)

    # bf16 weight streaming; classifier padded to a lane-dense 128-wide output.
    w_proj_bf16 = params["w_proj"].astype(jnp.bfloat16)
    w_cls_pad = jnp.zeros((PROJECTION_DIM, NUM_CLASSES_PAD), jnp.bfloat16)
    w_cls_pad = w_cls_pad.at[:, :NUM_CLASSES].set(params["w_cls"].astype(jnp.bfloat16))
    b_cls_pad = jnp.zeros((1, NUM_CLASSES_PAD), jnp.float32)
    b_cls_pad = b_cls_pad.at[:, :NUM_CLASSES].set(params["b_cls"])

    logits_pad = multimodal_head(vl_embeds, w_proj_bf16, w_cls_pad, b_cls_pad)
    return logits_pad[:, :NUM_CLASSES]


def init_params(key):
    k1, k2, k3 = jax.random.split(key, 3)
    # stored as (in_features, out_features) == PyTorch weight.T
    w_proj = jax.random.normal(k1, (PROJ_IN_DIM, PROJECTION_DIM), jnp.float32) * 0.02
    w_cls = jax.random.normal(k2, (PROJECTION_DIM, NUM_CLASSES), jnp.float32) * 0.02
    b_cls = jax.random.normal(k3, (1, NUM_CLASSES), jnp.float32) * 0.02
    return {"w_proj": w_proj, "w_cls": w_cls, "b_cls": b_cls}


if __name__ == "__main__":
    B = 2
    key = jax.random.PRNGKey(0)
    k_params, k_ct, k_xray, k_text = jax.random.split(key, 4)

    params = init_params(k_params)

    # synthetic backbone pooled outputs (one per image modality) + text CLS embedding
    img_embed_ct = jax.random.normal(k_ct, (B, VISION_EMBED_DIM), jnp.float32)
    img_embed_xray = jax.random.normal(k_xray, (B, VISION_EMBED_DIM), jnp.float32)
    text_embed = jax.random.normal(k_text, (B, TEXT_EMBED_DIM), jnp.float32)

    logits = multimodal_transformer_forward(
        [img_embed_ct, img_embed_xray], text_embed, params
    )
    jax.block_until_ready(logits)
    assert logits.shape == (B, NUM_CLASSES)

    # --- reference checks in plain JAX ---
    vl_f32 = jnp.concatenate([img_embed_ct, img_embed_xray, text_embed], axis=1)

    # (a) same bf16-weight math (tight tolerance)
    vl_bf = vl_f32.astype(jnp.bfloat16)
    h_bf = jnp.tanh(
        jnp.dot(vl_bf, params["w_proj"].astype(jnp.bfloat16),
                preferred_element_type=jnp.float32)
    ).astype(jnp.bfloat16)
    ref_bf = jnp.dot(h_bf, params["w_cls"].astype(jnp.bfloat16),
                     preferred_element_type=jnp.float32) + params["b_cls"]
    assert jnp.allclose(logits, ref_bf, atol=2e-3, rtol=2e-3)

    # (b) full-f32 PyTorch-equivalent math (bf16-weight tolerance)
    ref_f32 = jnp.tanh(vl_f32 @ params["w_proj"]) @ params["w_cls"] + params["b_cls"]
    assert jnp.allclose(logits, ref_f32, atol=2e-2, rtol=2e-2)

    print("KERNEL_OK")
</pallas_src>

<mosaic_0001>
module attributes {stable_mosaic.version = 11 : i64} {
  func.func @fusion_head_kernel(%arg0: i32, %arg1: memref<2x768xbf16, #tpu.memory_space<vmem>>, %arg2: memref<768x512xbf16, #tpu.memory_space<vmem>>, %arg3: memref<512x128xbf16, #tpu.memory_space<vmem>>, %arg4: memref<1x128xf32, #tpu.memory_space<vmem>>, %arg5: memref<2x128xf32, #tpu.memory_space<vmem>>, %arg6: memref<2x512xf32, #tpu.memory_space<vmem>>) attributes {dimension_semantics = [#tpu.dimension_semantics<arbitrary>], iteration_bounds = array<i64: 3>, scalar_prefetch = 0 : i64, scratch_operands = 1 : i64, tpu.core_type = #tpu.core_type<tc>, window_params = [{transform_indices = @transform_0, window_bounds = array<i64: 2, 768>}, {transform_indices = @transform_1, window_bounds = array<i64: 768, 512>}, {pipeline_mode = #tpu.pipeline_mode<synchronous>, transform_indices = @transform_2, window_bounds = array<i64: 512, 128>}, {pipeline_mode = #tpu.pipeline_mode<synchronous>, transform_indices = @transform_3, window_bounds = array<i64: 1, 128>}, {pipeline_mode = #tpu.pipeline_mode<synchronous>, transform_indices = @transform_4, window_bounds = array<i64: 2, 128>}]} {
    %c0_i32 = arith.constant 0 : i32
    %0 = arith.cmpi eq, %arg0, %c0_i32 : i32
    %1 = arith.extui %0 : i1 to i32
    %c0_i32_0 = arith.constant 0 : i32
    %2 = arith.cmpi ne, %1, %c0_i32_0 : i32
    scf.if %2 {
      %cst_9 = arith.constant 0.000000e+00 : f32
      %12 = vector.broadcast %cst_9 : f32 to vector<2x512xf32>
      %c0_10 = arith.constant 0 : index
      %c0_11 = arith.constant 0 : index
      %13 = vector.load %arg6[%c0_10, %c0_11] : memref<2x512xf32, #tpu.memory_space<vmem>>, vector<2x512xf32>
      tpu.vector_store %arg6[%c0_10, %c0_11], %12 {strides = array<i32>} : memref<2x512xf32, #tpu.memory_space<vmem>>, vector<2x512xf32>,
    } else {
    }
    %c0 = arith.constant 0 : index
    %c0_1 = arith.constant 0 : index
    %3 = vector.load %arg6[%c0, %c0_1] : memref<2x512xf32, #tpu.memory_space<vmem>>, vector<2x512xf32>
    %c0_2 = arith.constant 0 : index
    %c0_3 = arith.constant 0 : index
    %4 = vector.load %arg1[%c0_2, %c0_3] : memref<2x768xbf16, #tpu.memory_space<vmem>>, vector<2x768xbf16>
    %c0_4 = arith.constant 0 : index
    %c0_5 = arith.constant 0 : index
    %5 = vector.load %arg2[%c0_4, %c0_5] : memref<768x512xbf16, #tpu.memory_space<vmem>>, vector<768x512xbf16>
    %cst = arith.constant dense<0.000000e+00> : vector<2x512xf32>
    %6 = tpu.matmul %4, %5, %cst {dimension_numbers = #tpu.dot_dimension_numbers<[1], [0], [0], [1], [0, 0, 1, 1], [], []>} : vector<2x768xbf16>, vector<768x512xbf16>, vector<2x512xf32> -> vector<2x512xf32>
    %7 = arith.addf %3, %6 : vector<2x512xf32>
    %c0_6 = arith.constant 0 : index
    %c0_7 = arith.constant 0 : index
    %8 = vector.load %arg6[%c0_6, %c0_7] : memref<2x512xf32, #tpu.memory_space<vmem>>, vector<2x512xf32>
    tpu.vector_store %arg6[%c0_6, %c0_7], %7 {strides = array<i32>} : memref<2x512xf32, #tpu.memory_space<vmem>>, vector<2x512xf32>,
    %c2_i32 = arith.constant 2 : i32
    %9 = arith.cmpi eq, %arg0, %c2_i32 : i32
    %10 = arith.extui %9 : i1 to i32
    %c0_i32_8 = arith.constant 0 : i32
    %11 = arith.cmpi ne, %10, %c0_i32_8 : i32
    scf.if %11 {
      %c0_9 = arith.constant 0 : index
      %c0_10 = arith.constant 0 : index
      %12 = vector.load %arg6[%c0_9, %c0_10] : memref<2x512xf32, #tpu.memory_space<vmem>>, vector<2x512xf32>
      %13 = math.tanh %12 : vector<2x512xf32>
      %14 = arith.truncf %13 : vector<2x512xf32> to vector<2x512xbf16>
      %c0_11 = arith.constant 0 : index
      %c0_12 = arith.constant 0 : index
      %15 = vector.load %arg3[%c0_11, %c0_12] : memref<512x128xbf16, #tpu.memory_space<vmem>>, vector<512x128xbf16>
      %cst_13 = arith.constant dense<0.000000e+00> : vector<2x128xf32>
      %16 = tpu.matmul %14, %15, %cst_13 {dimension_numbers = #tpu.dot_dimension_numbers<[1], [0], [0], [1], [0, 0, 1, 1], [], []>} : vector<2x512xbf16>, vector<512x128xbf16>, vector<2x128xf32> -> vector<2x128xf32>
      %c0_14 = arith.constant 0 : index
      %c0_15 = arith.constant 0 : index
      %17 = vector.load %arg4[%c0_14, %c0_15] : memref<1x128xf32, #tpu.memory_space<vmem>>, vector<1x128xf32>
      %18 = vector.broadcast %17 : vector<1x128xf32> to vector<2x128xf32>
      %19 = arith.addf %16, %18 : vector<2x128xf32>
      %c0_16 = arith.constant 0 : index
      %c0_17 = arith.constant 0 : index
      %20 = vector.load %arg5[%c0_16, %c0_17] : memref<2x128xf32, #tpu.memory_space<vmem>>, vector<2x128xf32>
      tpu.vector_store %arg5[%c0_16, %c0_17], %19 {strides = array<i32>} : memref<2x128xf32, #tpu.memory_space<vmem>>, vector<2x128xf32>,
    } else {
    }
    return
  }
  func.func @transform_0(%arg0: i32) -> (i32, i32) {
    %c0_i32 = arith.constant 0 : i32
    %c0_i32_0 = arith.constant 0 : i32
    return %c0_i32, %arg0 : i32, i32
  }
  func.func @transform_1(%arg0: i32) -> (i32, i32) {
    %c0_i32 = arith.constant 0 : i32
    %c0_i32_0 = arith.constant 0 : i32
    return %arg0, %c0_i32 : i32, i32
  }
  func.func @transform_2(%arg0: i32) -> (i32, i32) {
    %c0_i32 = arith.constant 0 : i32
    %c0_i32_0 = arith.constant 0 : i32
    %c0_i32_1 = arith.constant 0 : i32
    return %c0_i32, %c0_i32_0 : i32, i32
  }
  func.func @transform_3(%arg0: i32) -> (i32, i32) {
    %c0_i32 = arith.constant 0 : i32
    %c0_i32_0 = arith.constant 0 : i32
    %c0_i32_1 = arith.constant 0 : i32
    return %c0_i32, %c0_i32_0 : i32, i32
  }
  func.func @transform_4(%arg0: i32) -> (i32, i32) {
    %c0_i32 = arith.constant 0 : i32
    %c0_i32_0 = arith.constant 0 : i32
    %c0_i32_1 = arith.constant 0 : i32
    return %c0_i32, %c0_i32_0 : i32, i32
  }
}

</mosaic_0001>

<bundles_post_ra>
// kernel: tpu_custom_call.1
= control target key start
LH: loop header
LB: loop body
LE: loop exit
PB: predicated region body
PF: predicated region fallthrough
CT: control target
= control target key end

     0   :  { %9 = vsyncpa [#allocation4], 0  ;;  %s3582_s0 = inlined_call_operand.hbm [shape: bf16[2,2304], index: 0, kind: input, shape index: {}]   ;;  %s3583_s1 = inlined_call_operand.hbm [shape: bf16[2304,512], index: 1, kind: input, shape index: {}]   ;;  %s3584_s2 = inlined_call_operand.hbm [shape: bf16[512,128], index: 2, kind: input, shape index: {}]   ;;  %s3585_s3 = inlined_call_operand.hbm [shape: f32[1,128], index: 3, kind: input, shape index: {}]   ;;  %s3586_s4 = inlined_call_operand.hbm [shape: f32[2,128], index: 4, kind: output, shape index: {}]  }
   0x1   :  { %11 = vsyncpa [#allocation4 + $0x1], 0 }
   0x2   :  { %12 = vsyncpa [#allocation7], 0 }
   0x3   :  { %14 = vsyncpa [#allocation7 + $0x1], 0 }
   0x4   :  { %15 = vsyncpa [#allocation10], 0 }
   0x5   :  { %16 = vsyncpa [#allocation5], 0  ;;  %s3148_s15 = smov 0   ;;  %s3150_s16 = smov 0  }
   0x6   :  { %s3152_s17 = smov 0   ;;  %s3154_s18 = smov 0  }
   0x7 LB: > { %s3167_s19 = sadd.s32 4294967295, %s3109_s18   ;;  %p42_p0 = scmp.ne.s32.totalorder %s3101_s16, %s3097_s15  ;;  %s3109_s18 = sphi %s3154_s18, %s3604_s18   ;;  %s3105_s17 = sphi %s3152_s17, %s3603_s17   ;;  %s3101_s16 = sphi %s3150_s16, %s3602_s16   ;;  %s3097_s15 = sphi %s3148_s15, %s3601_s15  }
   0x8   : > { %p3587_p1 = scmp.eq.s32.totalorder %s3167_s19, 0  ;;  %p2232_p2 = scmp.ge.s32.totalorder %s3109_s18, 1 }
   0x9   : > { %p142_p3 = scmp.lt.s32.totalorder %s3109_s18, 4  ;;  %s3111_s22 = smov [#allocation8]  }
   0xa   : > { %p3176_p5 = por %p3587_p1, %p42_p0  ;;  %s154_s23 = sshll.u32 %s3111_s22, 4  ;;  %s155_s23 = int_to_ptr.vmem [resolvable:$true] %s154_s23 }
   0xb   : > { %p3180_p6 = pnand %p2232_p2, %p142_p3  ;;  %s3112_s25 = smov [#allocation9]  }
   0xc   : > { %s3590_s20 = scalar_select %p3176_p5, 1, 0 }
   0xd   : > { %s3591_s21 = scalar_select %p3180_p6, 1, 0 }
   0xe   : > { %p2541_p7 = pneg %p3180_p6  ;;  %s168_s26 = sshll.u32 %s3112_s25, 4  ;;  %s169_s26 = int_to_ptr.vmem [resolvable:$true] %s168_s26 }
   0xf   : > { %s2938_s27 = scalar_lea.vmem %s155_s23, 4096  ;;  %p2946_p13 = scmp.lt.s32.totalorder %s155_s23, %s155_s23 }
  0x10   : > { %p3188_p8 = pnand %p2541_p7, %p3587_p1  ;;  %p2939_p10 = scmp.ne.s32.totalorder %s155_s23, %s2938_s27 }
  0x11   : > { %p2947_p0 = scmp.lt.s32.totalorder %s2938_s27, %s2938_s27 }
  0x12   : > { %p2929_p9 = pneg %p3188_p8 }
  0x13   : > { %p2948_p2 = por %p2947_p0, %p2946_p13 }
  0x14   : > { %p2941_p11 = pnand %p2939_p10, %p2929_p9 }
  0x16   : > { %p2942_p12 = pneg %p2941_p11 }
  0x18   : > { %p2949_p3 = pnand %p2948_p2, %p2942_p12 }
  0x1a   : > { %2952 = shalt.err (!%p2949_p3)
}
  0x1b   : > { %s3113_s28 = smov 64   ;;  %s3114_s29 = smov 4  }
  0x1c   : > { %2544 = dma.hbm_to_vmem [thread:$0]  (!%p3188_p8), %s3584_s2, 4096, %s155_s23, [#allocation7], %s3113_s28, %s3113_s28, %s3114_s29  }
  0x1d   : > { %s2964_s6 = scalar_lea.vmem %s169_s26, 16  ;;  %s2971_s7 = scalar_lea.vmem %s169_s26, 32 }
  0x1e   : > { %p2965_p7 = scmp.ne.s32.totalorder %s169_s26, %s2964_s6  ;;  %p2972_p4 = scmp.lt.s32.totalorder %s169_s26, %s169_s26 }
  0x1f   : > { %p2973_p13 = scmp.lt.s32.totalorder %s2971_s7, %s2964_s6 }
  0x20   : > { %p2967_p10 = pnand %p2965_p7, %p2929_p9 }
  0x21   : > { %p2974_p12 = por %p2973_p13, %p2972_p4 }
  0x22   : > { %p2968_p11 = pneg %p2967_p10 }
  0x24   : > { %p2975_p0 = pnand %p2974_p12, %p2968_p11 }
  0x26   : > { %2978 = shalt.err (!%p2975_p0)
}
  0x27   : > { %2547 = dma.hbm_to_vmem [thread:$0]  (!%p3188_p8), %s3585_s3, 16, %s169_s26, [#allocation10]  }
  0x28   : > { %s3211_s10 = sadd.s32 1, %s3109_s18   ;;  %s29_s11 = sadd.s32 1, %s3105_s17 }
  0x29   : > { %s26_s12 = ssub.s32 %s3109_s18, %s3211_s10  ;;  %p36_p4 = scmp.ne.s32.totalorder %s3105_s17, %s3101_s16 }
  0x2a   : > { %p27_p9 = scmp.eq.s32.totalorder %s26_s12, 0  ;;  %p37_p2 = scmp.eq.s32.totalorder %s3109_s18, 0 }
  0x2b   : > { %p2557_p3 = scmp.lt.s32.totalorder %s3109_s18, 3  ;;  %s3221_s13 = sand.u32 1, %s3105_s17  }
  0x2c   : > { %s3224_s14 = scalar_select %p27_p9, %s3105_s17, %s29_s11  }
  0x2d   : > { %p38_p7 = por %p37_p2, %p36_p4  ;;  %s2521_s15 = smul.u32 6, %s3221_s13 }
  0x2e   : > { %s198_s22 = sand.u32 1, %s3109_s18   ;;  %s2473_s23 = smul.u32 96, %s3109_s18 }
  0x2f   : > { %p3229_p8 = pnand %p2557_p3, %p38_p7  ;;  %s2522_s25 = smul.u32 1536, %s3221_s13 }
  0x30   : > { %s3237_s28 = scalar_lea.hbm %s3582_s0, %s2473_s23  ;;  %s183_s29 = scalar_lea.vmem [#allocation3], %s2521_s15 }
  0x31   : > { %s191_s30 = sshll.u32 %s183_s29, 4  ;;  %s180_s5 = scalar_lea.sflag [#allocation4], %s3221_s13  ;;  %s192_s30 = int_to_ptr.vmem [resolvable:$true] %s191_s30 }
  0x32   : > { %s2979_s6 = scalar_lea.hbm %s3237_s28, 96  ;;  %p2981_p11 = pneg %p3229_p8 }
  0x33   : > { %p2980_p10 = scmp.ne.s32.totalorder %s3237_s28, %s2979_s6  ;;  %s2984_s9 = scalar_lea.hbm %s3582_s0, 288 }
  0x34   : > { %p2985_p0 = scmp.lt.s32.totalorder %s3237_s28, %s3582_s0  ;;  %p2986_p4 = scmp.lt.s32.totalorder %s2984_s9, %s2979_s6 }
  0x35   : > { %p2982_p13 = pnand %p2981_p11, %p2980_p10 }
  0x36   : > { %p2987_p9 = por %p2986_p4, %p2985_p0 }
  0x37   : > { %p2983_p12 = pneg %p2982_p13 }
  0x39   : > { %p2988_p2 = pnand %p2987_p9, %p2983_p12 }
  0x3b   : > { %2991 = shalt.err (!%p2988_p2)
}
  0x3c   : > { %s2992_s15 = scalar_lea.vmem %s192_s30, 96  ;;  %s3115_s23 = smov [#allocation3]  }
  0x3d   : > { %p2993_p3 = scmp.ne.s32.totalorder %s192_s30, %s2992_s15  ;;  %s2997_s26 = sshll.u32 %s3115_s23, 4  ;;  %s2998_s26 = int_to_ptr.vmem [resolvable:$false] %s2997_s26 }
  0x3e   : > { %s2999_s27 = scalar_lea.vmem %s2998_s26, 192  ;;  %p3000_p13 = scmp.lt.s32.totalorder %s192_s30, %s2998_s26 }
  0x3f   : > { %p2995_p7 = pnand %p2993_p3, %p2981_p11  ;;  %p3001_p1 = scmp.lt.s32.totalorder %s2999_s27, %s2992_s15 }
  0x41   : > { %p2996_p10 = pneg %p2995_p7  ;;  %p3002_p5 = por %p3001_p1, %p3000_p13 }
  0x43   : > { %p3003_p6 = pnand %p3002_p5, %p2996_p10 }
  0x45   : > { %3006 = shalt.err (!%p3003_p6)
}
  0x46   : > { %2551 = dma.hbm_to_vmem [thread:$0]  (!%p3229_p8), %s3237_s28, 96, %s192_s30, %s180_s5  }
  0x47   : > { %s202_s29 = scalar_lea.vmem [#allocation6], %s2522_s25  ;;  %s2476_s7 = smul.u32 24576, %s3109_s18 }
  0x48   : > { %s210_s6 = sshll.u32 %s202_s29, 4  ;;  %s3272_s12 = scalar_lea.sflag [#allocation7], %s198_s22  ;;  %s3263_s6 = int_to_ptr.vmem [resolvable:$true] %s210_s6 }
  0x49   : > { %s3268_s11 = scalar_lea.hbm %s3583_s1, %s2476_s7  ;;  %s3012_s28 = scalar_lea.hbm %s3583_s1, 73728 }
  0x4a   : > { %s3007_s15 = scalar_lea.hbm %s3268_s11, 24576  ;;  %p3013_p12 = scmp.lt.s32.totalorder %s3268_s11, %s3583_s1 }
  0x4b   : > { %p3008_p1 = scmp.ne.s32.totalorder %s3268_s11, %s3007_s15  ;;  %p3014_p0 = scmp.lt.s32.totalorder %s3012_s28, %s3007_s15 }
  0x4d   : > { %p3010_p5 = pnand %p3008_p1, %p2981_p11  ;;  %p3015_p4 = por %p3014_p0, %p3013_p12 }
  0x4f   : > { %p3011_p6 = pneg %p3010_p5 }
  0x51   : > { %p3016_p9 = pnand %p3015_p4, %p3011_p6 }
  0x53   : > { %3019 = shalt.err (!%p3016_p9)
}
  0x54   : > { %s3020_s18 = scalar_lea.vmem %s3263_s6, 24576  ;;  %s3116_s22 = smov [#allocation6]  }
  0x55   : > { %p3021_p2 = scmp.ne.s32.totalorder %s3263_s6, %s3020_s18  ;;  %s3025_s23 = sshll.u32 %s3116_s22, 4  ;;  %s3026_s23 = int_to_ptr.vmem [resolvable:$false] %s3025_s23 }
  0x56   : > { %s3027_s26 = scalar_lea.vmem %s3026_s23, 49152  ;;  %p3028_p10 = scmp.lt.s32.totalorder %s3263_s6, %s3026_s23 }
  0x57   : > { %p3023_p3 = pnand %p3021_p2, %p2981_p11  ;;  %p3029_p13 = scmp.lt.s32.totalorder %s3027_s26, %s3020_s18 }
  0x59   : > { %p3024_p7 = pneg %p3023_p3  ;;  %p3030_p1 = por %p3029_p13, %p3028_p10 }
  0x5b   : > { %p3031_p5 = pnand %p3030_p1, %p3024_p7 }
  0x5d   : > { %3034 = shalt.err (!%p3031_p5)
}
  0x5e   : > { %s3117_s27 = smov 256   ;;  %s3118_s29 = smov 16  }
  0x5f   : > { %2554 = dma.hbm_to_vmem [thread:$0]  (!%p3229_p8), %s3268_s11, 24576, %s3263_s6, %s3272_s12, %s3117_s27, %s3117_s27, %s3118_s29  }
  0x60   : > { %p3594_p11 = scmp.ne.s32.totalorder %s3591_s21, 0 }
  0x61   : > { %s224_s7 = sand.u32 (!%p3594_p11), 1, %s3101_s16   ;;  %p3595_p6 = scmp.ne.s32.totalorder (!%p3594_p11), %s3590_s20, 0 }
  0x62   : > { %222 = sbr.rel (%p3594_p11) target bundleno = 775 (0x307), region = 36  ;;  %s225_s9 = scalar_lea.sflag (!%p3594_p11), [#allocation4], %s224_s7 }
  0x63   : > { %s2523_s8 = smul.u32 (!%p3594_p11), 6, %s224_s7 }
  0x65   : > { %s3300_s15 = scalar_lea.vmem (!%p3594_p11), [#allocation3], %s2523_s8 }
  0x67   : > { %3076 = dma.done.wait (%p3595_p6), %s225_s9, 96  }
  0x68   : > { %3078 = vsyncadd (%p3595_p6), %s225_s9, 4294967200  ;;  %s233_s13 = sand.u32 1, %s3167_s19   ;;  %s2524_s24 = smul.u32 1536, %s224_s7 }
  0x69   : > { %s234_s6 = scalar_lea.sflag [#allocation7], %s233_s13 }
  0x6a   : > { %s3307_s11 = scalar_lea.vmem [#allocation6], %s2524_s24 }
  0x6b   : > { %3080 = dma.done.wait (%p3595_p6), %s234_s6, 24576  }
  0x6c   : > { %3082 = vsyncadd (%p3595_p6), %s234_s6, 4294942720  ;;  %p3596_p8 = scmp.eq.s32.totalorder %s3167_s19, 0 }
  0x6e   : > { %3084 = dma.done.wait (%p3596_p8), [#allocation7], 4096   ;;  %p3597_p12 = pmov %p3596_p8 }
  0x6f   : > { %p3598_p0 = pmov %p3596_p8 }
  0x70   : > { %3086 = vsyncadd (%p3597_p12), [#allocation7], 4294963200 }
  0x71   : > { %3088 = dma.done.wait (%p3598_p0), [#allocation10], 16   ;;  %p3599_p4 = pmov %p3598_p0 }
  0x72   : > { %p3600_p9 = scmp.ne.s32.totalorder %s3167_s19, 0 }
  0x73   : > { %3090 = vsyncadd (%p3599_p4), [#allocation10], 4294967280 }
  0x74   : > { %276 = sbr.rel (%p3600_p9) target bundleno = 123 (0x7b), region = 56 }
  0x79   : > { %v3119_v0 = vmov 0.0  }
  0x7a   : > { %277 = vst [vmem:[#allocation2] sm:$0xff] %v3119_v0 }
  0x7b PF: > { %v2604_v1 = vld [vmem:[%s3307_s11 + $0xe4] ss:$16 sps:$4 sm:$0xff]   ;;  %v2608_v3 = vld [vmem:[%s3307_s11 + $0xe0] ss:$16 sps:$4 sm:$0xff]   ;;  %v3120_v37 = vmov 1966171168   ;;  %v477_v39 = vlaneseq }
  0x7c   : > { %v2606_v2 = vld [vmem:[%s3307_s11 + $0x2e4] ss:$16 sps:$4 sm:$0xff]   ;;  %1486 = vmatprep.subr.bf16.mxu0 %v2604_v1  ;;  %v2609_v4 = vld [vmem:[%s3307_s11 + $0x2e0] ss:$16 sps:$4 sm:$0xff]   ;;  %v475_v38 = vunpack.c.l.s4 %v3120_v37  ;;  %p2435_p2 = scmp.ne.s32.totalorder %s3167_s19, 2 }
  0x7d   : > { %1527 = vmatprep.subr.bf16.mxu1 %v2606_v2  ;;  %v2610_v5 = vld [vmem:[%s3307_s11 + $0xc4] ss:$16 sps:$4 sm:$0xff]   ;;  %1487 = vmatpush1.bf16.msra.mxu0 %v2608_v3  ;;  %v2614_v7 = vld [vmem:[%s3307_s11 + $0xc0] ss:$16 sps:$4 sm:$0xff]   ;;  %v3362_v44 = vshrl.u32 %v477_v39, 7 }
  0x7e   : > { %1528 = vmatpush1.bf16.msra.mxu1 %v2609_v4  ;;  %v2612_v6 = vld [vmem:[%s3307_s11 + $0x2c4] ss:$16 sps:$4 sm:$0xff]   ;;  %1488 = vmatprep.subr.bf16.mxu0 %v2610_v5  ;;  %v2615_v8 = vld [vmem:[%s3307_s11 + $0x2c0] ss:$16 sps:$4 sm:$0xff]   ;;  %v476_v43 = vunpack.c.0.s8 %v475_v38  ;;  %v2727_v38 = vld [vmem:[%s3307_s11 + $0x68] ss:$16 sps:$4 sm:$0xff]  }
  0x7f   : > { %1529 = vmatprep.subr.bf16.mxu1 %v2612_v6  ;;  %v2616_v9 = vld [vmem:[%s3307_s11 + $0xa4] ss:$16 sps:$4 sm:$0xff]   ;;  %v2620_v11 = vld [vmem:[%s3307_s11 + $0xa0] ss:$16 sps:$4 sm:$0xff]  }
  0x80   : > { %v2618_v10 = vld [vmem:[%s3307_s11 + $0x2a4] ss:$16 sps:$4 sm:$0xff]   ;;  %v2621_v12 = vld [vmem:[%s3307_s11 + $0x2a0] ss:$16 sps:$4 sm:$0xff]   ;;  %v3370_v50 = vsub.s32 %v476_v43, %v3362_v44 }
  0x81   : > { %1489 = vmatpush1.bf16.msra.mxu0 %v2614_v7  ;;  %v2622_v13 = vld [vmem:[%s3307_s11 + $0x84] ss:$16 sps:$4 sm:$0xff]   ;;  %v2626_v15 = vld [vmem:[%s3307_s11 + $0x80] ss:$16 sps:$4 sm:$0xff]  }
  0x82   : > { %1530 = vmatpush1.bf16.msra.mxu1 %v2615_v8  ;;  %1490 = vmatprep.subr.bf16.mxu0 %v2616_v9  ;;  %v2624_v14 = vld [vmem:[%s3307_s11 + $0x284] ss:$16 sps:$4 sm:$0xff]   ;;  %v2627_v16 = vld [vmem:[%s3307_s11 + $0x280] ss:$16 sps:$4 sm:$0xff]  }
  0x83   : > { %1531 = vmatprep.subr.bf16.mxu1 %v2618_v10  ;;  %v2628_v17 = vld [vmem:[%s3307_s11 + $0x64] ss:$16 sps:$4 sm:$0xff]   ;;  %v2632_v19 = vld [vmem:[%s3307_s11 + $0x60] ss:$16 sps:$4 sm:$0xff]  }
  0x84   : > { %v2630_v18 = vld [vmem:[%s3307_s11 + $0x264] ss:$16 sps:$4 sm:$0xff]   ;;  %v2633_v20 = vld [vmem:[%s3307_s11 + $0x260] ss:$16 sps:$4 sm:$0xff]  }
  0x85   : > { %1491 = vmatpush1.bf16.msra.mxu0 %v2620_v11  ;;  %v2634_v21 = vld [vmem:[%s3307_s11 + $0x44] ss:$16 sps:$4 sm:$0xff]   ;;  %v2638_v23 = vld [vmem:[%s3307_s11 + $0x40] ss:$16 sps:$4 sm:$0xff]  }
  0x86   : > { %1532 = vmatpush1.bf16.msra.mxu1 %v2621_v12  ;;  %1492 = vmatprep.subr.bf16.mxu0 %v2622_v13  ;;  %v2636_v22 = vld [vmem:[%s3307_s11 + $0x244] ss:$16 sps:$4 sm:$0xff]   ;;  %v2639_v24 = vld [vmem:[%s3307_s11 + $0x240] ss:$16 sps:$4 sm:$0xff]  }
  0x87   : > { %1533 = vmatprep.subr.bf16.mxu1 %v2624_v14  ;;  %v2640_v25 = vld [vmem:[%s3307_s11 + $0x24] ss:$16 sps:$4 sm:$0xff]   ;;  %v2644_v27 = vld [vmem:[%s3307_s11 + $0x20] ss:$16 sps:$4 sm:$0xff]  }
  0x88   : > { %v2642_v26 = vld [vmem:[%s3307_s11 + $0x224] ss:$16 sps:$4 sm:$0xff]   ;;  %v2645_v28 = vld [vmem:[%s3307_s11 + $0x220] ss:$16 sps:$4 sm:$0xff]  }
  0x89   : > { %1493 = vmatpush1.bf16.msra.mxu0 %v2626_v15  ;;  %v2646_v29 = vld [vmem:[%s3307_s11 + $0x4] ss:$16 sps:$4 sm:$0xff]   ;;  %v2650_v31 = vld [vmem:[%s3307_s11] ss:$16 sps:$4 sm:$0xff]  }
  0x8a   : > { %1534 = vmatpush1.bf16.msra.mxu1 %v2627_v16  ;;  %1494 = vmatprep.subr.bf16.mxu0 %v2628_v17  ;;  %v2648_v30 = vld [vmem:[%s3307_s11 + $0x204] ss:$16 sps:$4 sm:$0xff]   ;;  %v2651_v32 = vld [vmem:[%s3307_s11 + $0x200] ss:$16 sps:$4 sm:$0xff]   ;;  %v2705_v17 = vld [vmem:[%s3307_s11 + $0xec] ss:$16 sps:$4 sm:$0xff]  }
  0x8b   : > { %1535 = vmatprep.subr.bf16.mxu1 %v2630_v18  ;;  %v2652_v33 = vld [vmem:[%s3307_s11 + $0x1e4] ss:$16 sps:$4 sm:$0xff]   ;;  %v2656_v35 = vld [vmem:[%s3307_s11 + $0x1e0] ss:$16 sps:$4 sm:$0xff]  }
  0x8c   : > { %v2654_v34 = vld [vmem:[%s3307_s11 + $0x3e4] ss:$16 sps:$4 sm:$0xff]   ;;  %v2657_v36 = vld [vmem:[%s3307_s11 + $0x3e0] ss:$16 sps:$4 sm:$0xff]  }
  0x8d   : > { %1495 = vmatpush1.bf16.msra.mxu0 %v2632_v19  ;;  %v2658_v40 = vld [vmem:[%s3307_s11 + $0x1c4] ss:$16 sps:$4 sm:$0xff]   ;;  %v2662_v42 = vld [vmem:[%s3307_s11 + $0x1c0] ss:$16 sps:$4 sm:$0xff]  }
  0x8e   : > { %1536 = vmatpush1.bf16.msra.mxu1 %v2633_v20  ;;  %1496 = vmatprep.subr.bf16.mxu0 %v2634_v21  ;;  %v2660_v41 = vld [vmem:[%s3307_s11 + $0x3c4] ss:$16 sps:$4 sm:$0xff]   ;;  %v2663_v45 = vld [vmem:[%s3307_s11 + $0x3c0] ss:$16 sps:$4 sm:$0xff]   ;;  %v2703_v21 = vld [vmem:[%s3307_s11 + $0xe8] ss:$16 sps:$4 sm:$0xff]  }
  0x8f   : > { %1537 = vmatprep.subr.bf16.mxu1 %v2636_v22  ;;  %v2664_v46 = vld [vmem:[%s3307_s11 + $0x1a4] ss:$16 sps:$4 sm:$0xff]   ;;  %v2668_v48 = vld [vmem:[%s3307_s11 + $0x1a0] ss:$16 sps:$4 sm:$0xff]  }
  0x90   : > { %v2666_v47 = vld [vmem:[%s3307_s11 + $0x3a4] ss:$16 sps:$4 sm:$0xff]   ;;  %v2669_v49 = vld [vmem:[%s3307_s11 + $0x3a0] ss:$16 sps:$4 sm:$0xff]  }
  0x91   : > { %1497 = vmatpush1.bf16.msra.mxu0 %v2638_v23  ;;  %v2670_v51 = vld [vmem:[%s3307_s11 + $0x184] ss:$16 sps:$4 sm:$0xff]   ;;  %v2674_v54 = vld [vmem:[%s3307_s11 + $0x180] ss:$16 sps:$4 sm:$0xff]   ;;  %v2711_v23 = vld [vmem:[%s3307_s11 + $0xcc] ss:$16 sps:$4 sm:$0xff]  }
  0x92   : > { %1538 = vmatpush1.bf16.msra.mxu1 %v2639_v24  ;;  %1498 = vmatprep.subr.bf16.mxu0 %v2640_v25  ;;  %v2672_v52 = vld [vmem:[%s3307_s11 + $0x384] ss:$16 sps:$4 sm:$0xff]   ;;  %v2675_v57 = vld [vmem:[%s3307_s11 + $0x380] ss:$16 sps:$4 sm:$0xff]  }
  0x93   : > { %1539 = vmatprep.subr.bf16.mxu1 %v2642_v26  ;;  %v279_v53 = vld [vmem:[%s3300_s15] sm:$0x3f]  ;;  %v2680_v62 = vld [vmem:[%s3307_s11 + $0x160] ss:$16 sps:$4 sm:$0xff]  }
  0x94   : > { %v480_v55 = vrot.slane %v279_v53, %v3370_v50  ;;  %v473_v56 = vcombine.high %v279_v53, %v279_v53  ;;  %v2676_v58 = vld [vmem:[%s3307_s11 + $0x164] ss:$16 sps:$4 sm:$0xff]   ;;  %v2681_v1 = vld [vmem:[%s3307_s11 + $0x360] ss:$16 sps:$4 sm:$0xff]   ;;  %v2709_v26 = vld [vmem:[%s3307_s11 + $0xc8] ss:$16 sps:$4 sm:$0xff]  }
  0x95   : > { %1499 = vmatpush1.bf16.msra.mxu0 %v2644_v27  ;;  %v2678_v59 = vld [vmem:[%s3307_s11 + $0x364] ss:$16 sps:$4 sm:$0xff]   ;;  %v2686_v5 = vld [vmem:[%s3307_s11 + $0x140] ss:$16 sps:$4 sm:$0xff]   ;;  %v2753_v53 = vld [vmem:[%s3307_s11 + $0x1ec] ss:$16 sps:$4 sm:$0xff]  }
  0x96   : > { %1540 = vmatpush1.bf16.msra.mxu1 %v2645_v28  ;;  %1500 = vmatprep.subr.bf16.mxu0 %v2646_v29  ;;  %v488_v60 = vcombine.high %v480_v55, %v480_v55  ;;  %v487_v61 = vrot.slane %v473_v56, %v3370_v50  ;;  %v2682_v2 = vld [vmem:[%s3307_s11 + $0x144] ss:$16 sps:$4 sm:$0xff]   ;;  %v2687_v6 = vld [vmem:[%s3307_s11 + $0x340] ss:$16 sps:$4 sm:$0xff]   ;;  %v3402_v14 = vrot.slane %v480_v55, %v3370_v50  ;;  %v2717_v28 = vld [vmem:[%s3307_s11 + $0xac] ss:$16 sps:$4 sm:$0xff]  }
  0x97   : > { %1541 = vmatprep.subr.bf16.mxu1 %v2648_v30  ;;  %v2684_v3 = vld [vmem:[%s3307_s11 + $0x344] ss:$16 sps:$4 sm:$0xff]   ;;  %v2692_v9 = vld [vmem:[%s3307_s11 + $0x120] ss:$16 sps:$4 sm:$0xff]   ;;  %v2715_v30 = vld [vmem:[%s3307_s11 + $0xa8] ss:$16 sps:$4 sm:$0xff]  }
  0x98   : > { %v510_v63 = vrot.slane %v488_v60, %v3370_v50  ;;  %v3384_v0 = vrot.slane %v487_v61, %v3370_v50  ;;  %v2688_v7 = vld [vmem:[%s3307_s11 + $0x124] ss:$16 sps:$4 sm:$0xff]   ;;  %v2693_v10 = vld [vmem:[%s3307_s11 + $0x320] ss:$16 sps:$4 sm:$0xff]   ;;  %v489_v18 = vcombine.high %v487_v61, %v487_v61  ;;  %v3409_v19 = vcombine.high %v3402_v14, %v3402_v14  ;;  %v2751_v55 = vld [vmem:[%s3307_s11 + $0x1e8] ss:$16 sps:$4 sm:$0xff]  }
  0x99   : > { %1501 = vmatpush1.bf16.msra.mxu0 %v2650_v31  ;;  %v2690_v8 = vld [vmem:[%s3307_s11 + $0x324] ss:$16 sps:$4 sm:$0xff]   ;;  %v2698_v13 = vld [vmem:[%s3307_s11 + $0x100] ss:$16 sps:$4 sm:$0xff]   ;;  %v2765_v61 = vld [vmem:[%s3307_s11 + $0x1ac] ss:$16 sps:$4 sm:$0xff]  }
  0x9a   : > { %1542 = vmatpush1.bf16.msra.mxu1 %v2651_v32  ;;  %1502 = vmatprep.subr.bf16.mxu0 %v2652_v33  ;;  %v3389_v4 = vcombine.high %v510_v63, %v510_v63  ;;  %v2694_v11 = vld [vmem:[%s3307_s11 + $0x104] ss:$16 sps:$4 sm:$0xff]   ;;  %v2699_v15 = vld [vmem:[%s3307_s11 + $0x300] ss:$16 sps:$4 sm:$0xff]   ;;  %v3416_v24 = vrot.slane %v489_v18, %v3370_v50  ;;  %v2723_v32 = vld [vmem:[%s3307_s11 + $0x8c] ss:$16 sps:$4 sm:$0xff]  }
  0x9b   : > { %1543 = vmatprep.subr.bf16.mxu1 %v2654_v34  ;;  %1518 = vmatprep.mubr.bf16.mxu0 %v510_v63  ;;  %v2696_v12 = vld [vmem:[%s3307_s11 + $0x304] ss:$16 sps:$4 sm:$0xff]   ;;  %v2700_v20 = vld [vmem:[%s3307_s11 + $0x4e0] ss:$16 sps:$4 sm:$0xff]   ;;  %v2721_v34 = vld [vmem:[%s3307_s11 + $0x88] ss:$16 sps:$4 sm:$0xff]  }
  0x9c   : > { %1559 = vmatprep.mubr.bf16.mxu1 %v3389_v4  ;;  %v2702_v16 = vld [vmem:[%s3307_s11 + $0x4e4] ss:$16 sps:$4 sm:$0xff]   ;;  %v2706_v25 = vld [vmem:[%s3307_s11 + $0x4c0] ss:$16 sps:$4 sm:$0xff]   ;;  %v2787_v18 = vld [vmem:[%s3307_s11 + $0x128] ss:$16 sps:$4 sm:$0xff]  }
  0x9d   : > { %1503 = vmatpush2.bf16.msra.mxu0 %v2656_v35  ;;  %v2708_v22 = vld [vmem:[%s3307_s11 + $0x4c4] ss:$16 sps:$4 sm:$0xff]   ;;  %v2712_v29 = vld [vmem:[%s3307_s11 + $0x4a0] ss:$16 sps:$4 sm:$0xff]  }
  0x9e   : > { %1544 = vmatpush2.bf16.msra.mxu1 %v2657_v36  ;;  %1504 = vmatprep.subr.bf16.mxu0 %v2658_v40  ;;  %v2714_v27 = vld [vmem:[%s3307_s11 + $0x4a4] ss:$16 sps:$4 sm:$0xff]   ;;  %v2718_v33 = vld [vmem:[%s3307_s11 + $0x480] ss:$16 sps:$4 sm:$0xff]   ;;  %v2729_v36 = vld [vmem:[%s3307_s11 + $0x6c] ss:$16 sps:$4 sm:$0xff]  }
  0x9f   : > { %1545 = vmatprep.subr.bf16.mxu1 %v2660_v41  ;;  %v2720_v31 = vld [vmem:[%s3307_s11 + $0x484] ss:$16 sps:$4 sm:$0xff]   ;;  %v2724_v37 = vld [vmem:[%s3307_s11 + $0x460] ss:$16 sps:$4 sm:$0xff]   ;;  %v2735_v40 = vld [vmem:[%s3307_s11 + $0x4c] ss:$16 sps:$4 sm:$0xff]  }
  0xa0   : > { %v2726_v35 = vld [vmem:[%s3307_s11 + $0x464] ss:$16 sps:$4 sm:$0xff]   ;;  %v2730_v41 = vld [vmem:[%s3307_s11 + $0x440] ss:$16 sps:$4 sm:$0xff]  }
  0xa1   : > { %1505 = vmatpush2.bf16.msra.mxu0 %v2662_v42  ;;  %v2732_v39 = vld [vmem:[%s3307_s11 + $0x444] ss:$16 sps:$4 sm:$0xff]   ;;  %v2733_v42 = vld [vmem:[%s3307_s11 + $0x48] ss:$16 sps:$4 sm:$0xff]   ;;  %v2742_v50 = vld [vmem:[%s3307_s11 + $0x400] ss:$16 sps:$4 sm:$0xff]  }
  0xa2   : > { %1546 = vmatpush2.bf16.msra.mxu1 %v2663_v45  ;;  %1506 = vmatprep.subr.bf16.mxu0 %v2664_v46  ;;  %v2738_v43 = vld [vmem:[%s3307_s11 + $0x424] ss:$16 sps:$4 sm:$0xff]   ;;  %v2741_v45 = vld [vmem:[%s3307_s11 + $0x2c] ss:$16 sps:$4 sm:$0xff]   ;;  %v2736_v46 = vld [vmem:[%s3307_s11 + $0x420] ss:$16 sps:$4 sm:$0xff]  }
  0xa3   : > { %1547 = vmatprep.subr.bf16.mxu1 %v2666_v47  ;;  %v2739_v47 = vld [vmem:[%s3307_s11 + $0x28] ss:$16 sps:$4 sm:$0xff]   ;;  %v2756_v56 = vld [vmem:[%s3307_s11 + $0x5c4] ss:$16 sps:$4 sm:$0xff]  }
  0xa4   : > { %v2762_v60 = vld [vmem:[%s3307_s11 + $0x5a4] ss:$16 sps:$4 sm:$0xff]  }
  0xa5   : > { %1507 = vmatpush2.bf16.msra.mxu0 %v2668_v48  ;;  %v2744_v48 = vld [vmem:[%s3307_s11 + $0x404] ss:$16 sps:$4 sm:$0xff]  }
  0xa6   : > { %1548 = vmatpush2.bf16.msra.mxu1 %v2669_v49  ;;  %1508 = vmatprep.subr.bf16.mxu0 %v2670_v51  ;;  %v2747_v49 = vld [vmem:[%s3307_s11 + $0xc] ss:$16 sps:$4 sm:$0xff]   ;;  %v2745_v51 = vld [vmem:[%s3307_s11 + $0x8] ss:$16 sps:$4 sm:$0xff]  }
  0xa7   : > { %1549 = vmatprep.subr.bf16.mxu1 %v2672_v52  ;;  %v2750_v52 = vld [vmem:[%s3307_s11 + $0x5e4] ss:$16 sps:$4 sm:$0xff]  }
  0xa9   : > { %1509 = vmatpush2.bf16.msra.mxu0 %v2674_v54  ;;  %v2748_v54 = vld [vmem:[%s3307_s11 + $0x5e0] ss:$16 sps:$4 sm:$0xff]  }
  0xaa   : > { %1550 = vmatpush2.bf16.msra.mxu1 %v2675_v57  ;;  %1510 = vmatprep.subr.bf16.mxu0 %v2676_v58  ;;  %v2759_v57 = vld [vmem:[%s3307_s11 + $0x1cc] ss:$16 sps:$4 sm:$0xff]   ;;  %v2754_v58 = vld [vmem:[%s3307_s11 + $0x5c0] ss:$16 sps:$4 sm:$0xff]  }
  0xab   : > { %1551 = vmatprep.subr.bf16.mxu1 %v2678_v59  ;;  %v2757_v59 = vld [vmem:[%s3307_s11 + $0x1c8] ss:$16 sps:$4 sm:$0xff]  }
  0xad   : > { %1511 = vmatpush2.bf16.msra.mxu0 %v2680_v62  ;;  %v2760_v62 = vld [vmem:[%s3307_s11 + $0x5a0] ss:$16 sps:$4 sm:$0xff]  }
  0xae   : > { %1552 = vmatpush2.bf16.msra.mxu1 %v2681_v1  ;;  %1512 = vmatprep.subr.bf16.mxu0 %v2682_v2  ;;  %v2768_v1 = vld [vmem:[%s3307_s11 + $0x584] ss:$16 sps:$4 sm:$0xff]   ;;  %v2771_v2 = vld [vmem:[%s3307_s11 + $0x18c] ss:$16 sps:$4 sm:$0xff]  }
  0xaf   : > { %1553 = vmatprep.subr.bf16.mxu1 %v2684_v3  ;;  %v2766_v3 = vld [vmem:[%s3307_s11 + $0x580] ss:$16 sps:$4 sm:$0xff]  }
  0xb1   : > { %1513 = vmatpush2.bf16.msra.mxu0 %v2686_v5  ;;  %v2769_v5 = vld [vmem:[%s3307_s11 + $0x188] ss:$16 sps:$4 sm:$0xff]  }
  0xb2   : > { %1554 = vmatpush2.bf16.msra.mxu1 %v2687_v6  ;;  %1514 = vmatprep.subr.bf16.mxu0 %v2688_v7  ;;  %v2774_v6 = vld [vmem:[%s3307_s11 + $0x564] ss:$16 sps:$4 sm:$0xff]   ;;  %v2777_v7 = vld [vmem:[%s3307_s11 + $0x16c] ss:$16 sps:$4 sm:$0xff]  }
  0xb3   : > { %1555 = vmatprep.subr.bf16.mxu1 %v2690_v8  ;;  %v2772_v8 = vld [vmem:[%s3307_s11 + $0x560] ss:$16 sps:$4 sm:$0xff]  }
  0xb5   : > { %1515 = vmatpush2.bf16.msra.mxu0 %v2692_v9  ;;  %v2775_v9 = vld [vmem:[%s3307_s11 + $0x168] ss:$16 sps:$4 sm:$0xff]  }
  0xb6   : > { %1556 = vmatpush2.bf16.msra.mxu1 %v2693_v10  ;;  %1516 = vmatprep.subr.bf16.mxu0 %v2694_v11  ;;  %v2780_v10 = vld [vmem:[%s3307_s11 + $0x544] ss:$16 sps:$4 sm:$0xff]   ;;  %v2783_v11 = vld [vmem:[%s3307_s11 + $0x14c] ss:$16 sps:$4 sm:$0xff]  }
  0xb7   : > { %1557 = vmatprep.subr.bf16.mxu1 %v2696_v12  ;;  %v2778_v12 = vld [vmem:[%s3307_s11 + $0x540] ss:$16 sps:$4 sm:$0xff]  }
  0xb9   : > { %1517 = vmatpush2.bf16.msra.mxu0 %v2698_v13  ;;  %v2781_v13 = vld [vmem:[%s3307_s11 + $0x148] ss:$16 sps:$4 sm:$0xff]  }
  0xba   : > { %1558 = vmatpush2.bf16.msra.mxu1 %v2699_v15  ;;  %1568 = vmatprep.subr.bf16.mxu0 %v2702_v16  ;;  %v2786_v15 = vld [vmem:[%s3307_s11 + $0x524] ss:$16 sps:$4 sm:$0xff]   ;;  %v2789_v16 = vld [vmem:[%s3307_s11 + $0x12c] ss:$16 sps:$4 sm:$0xff]  }
  0xbb   : > { %1609 = vmatprep.subr.bf16.mxu1 %v2705_v17  ;;  %v2784_v17 = vld [vmem:[%s3307_s11 + $0x520] ss:$16 sps:$4 sm:$0xff]  }
  0xbc   : > { %1519 = vmatmul.mubr.bf16.vlgmr.msra.gmra.mxu0 %v3402_v14 }
  0xbd   : > { %1560 = vmatmul.mubr.bf16.vlgmr.msra.gmra.mxu1 %v3409_v19  ;;  %1569 = vmatpush1.bf16.msra.mxu0 %v2700_v20  ;;  %v2792_v20 = vld [vmem:[%s3307_s11 + $0x504] ss:$16 sps:$4 sm:$0xff]  }
  0xbe   : > { %1610 = vmatpush1.bf16.msra.mxu1 %v2703_v21  ;;  %1570 = vmatprep.subr.bf16.mxu0 %v2708_v22  ;;  %v2795_v21 = vld [vmem:[%s3307_s11 + $0x10c] ss:$16 sps:$4 sm:$0xff]   ;;  %v2790_v22 = vld [vmem:[%s3307_s11 + $0x500] ss:$16 sps:$4 sm:$0xff]  }
  0xbf   : > { %1611 = vmatprep.subr.bf16.mxu1 %v2711_v23  ;;  %1600 = vmatprep.mubr.bf16.mxu0 %v3416_v24  ;;  %v2793_v23 = vld [vmem:[%s3307_s11 + $0x108] ss:$16 sps:$4 sm:$0xff]  }
  0xc0   : > { %1641 = vmatprep.mubr.bf16.mxu1 %v510_v63  ;;  %v2763_v63 = vld [vmem:[%s3307_s11 + $0x1a8] ss:$16 sps:$4 sm:$0xff]  }
  0xc1   : > { %1571 = vmatpush1.bf16.msra.mxu0 %v2706_v25  ;;  %v2799_v25 = vld [vmem:[%s3307_s11 + $0x2ec] ss:$16 sps:$4 sm:$0xff]  }
  0xc2   : > { %1612 = vmatpush1.bf16.msra.mxu1 %v2709_v26  ;;  %1572 = vmatprep.subr.bf16.mxu0 %v2714_v27  ;;  %v2802_v26 = vld [vmem:[%s3307_s11 + $0x4ec] ss:$16 sps:$4 sm:$0xff]   ;;  %v2797_v27 = vld [vmem:[%s3307_s11 + $0x2e8] ss:$16 sps:$4 sm:$0xff]  }
  0xc3   : > { %1613 = vmatprep.subr.bf16.mxu1 %v2717_v28  ;;  %v2800_v28 = vld [vmem:[%s3307_s11 + $0x4e8] ss:$16 sps:$4 sm:$0xff]  }
  0xc5   : > { %1573 = vmatpush1.bf16.msra.mxu0 %v2712_v29  ;;  %v2805_v29 = vld [vmem:[%s3307_s11 + $0x2cc] ss:$16 sps:$4 sm:$0xff]  }
  0xc6   : > { %1614 = vmatpush1.bf16.msra.mxu1 %v2715_v30  ;;  %1574 = vmatprep.subr.bf16.mxu0 %v2720_v31  ;;  %v2808_v30 = vld [vmem:[%s3307_s11 + $0x4cc] ss:$16 sps:$4 sm:$0xff]   ;;  %v2803_v31 = vld [vmem:[%s3307_s11 + $0x2c8] ss:$16 sps:$4 sm:$0xff]  }
  0xc7   : > { %1615 = vmatprep.subr.bf16.mxu1 %v2723_v32  ;;  %v2806_v32 = vld [vmem:[%s3307_s11 + $0x4c8] ss:$16 sps:$4 sm:$0xff]  }
  0xc9   : > { %1575 = vmatpush1.bf16.msra.mxu0 %v2718_v33  ;;  %v2811_v33 = vld [vmem:[%s3307_s11 + $0x2ac] ss:$16 sps:$4 sm:$0xff]  }
  0xca   : > { %1616 = vmatpush1.bf16.msra.mxu1 %v2721_v34  ;;  %1576 = vmatprep.subr.bf16.mxu0 %v2726_v35  ;;  %v2814_v34 = vld [vmem:[%s3307_s11 + $0x4ac] ss:$16 sps:$4 sm:$0xff]   ;;  %v2812_v35 = vld [vmem:[%s3307_s11 + $0x4a8] ss:$16 sps:$4 sm:$0xff]  }
  0xcb   : > { %1617 = vmatprep.subr.bf16.mxu1 %v2729_v36  ;;  %v2817_v36 = vld [vmem:[%s3307_s11 + $0x28c] ss:$16 sps:$4 sm:$0xff]  }
  0xcd   : > { %1577 = vmatpush1.bf16.msra.mxu0 %v2724_v37  ;;  %v2820_v37 = vld [vmem:[%s3307_s11 + $0x48c] ss:$16 sps:$4 sm:$0xff]  }
  0xce   : > { %1618 = vmatpush1.bf16.msra.mxu1 %v2727_v38  ;;  %1578 = vmatprep.subr.bf16.mxu0 %v2732_v39  ;;  %v2815_v38 = vld [vmem:[%s3307_s11 + $0x288] ss:$16 sps:$4 sm:$0xff]   ;;  %v2826_v39 = vld [vmem:[%s3307_s11 + $0x46c] ss:$16 sps:$4 sm:$0xff]  }
  0xcf   : > { %1619 = vmatprep.subr.bf16.mxu1 %v2735_v40  ;;  %v2821_v40 = vld [vmem:[%s3307_s11 + $0x268] ss:$16 sps:$4 sm:$0xff]  }
  0xd1   : > { %1579 = vmatpush1.bf16.msra.mxu0 %v2730_v41  ;;  %v2824_v41 = vld [vmem:[%s3307_s11 + $0x468] ss:$16 sps:$4 sm:$0xff]  }
  0xd2   : > { %1620 = vmatpush1.bf16.msra.mxu1 %v2733_v42  ;;  %1580 = vmatprep.subr.bf16.mxu0 %v2738_v43  ;;  %v2829_v42 = vld [vmem:[%s3307_s11 + $0x24c] ss:$16 sps:$4 sm:$0xff]  }
  0xd3   : > { %1621 = vmatprep.subr.bf16.mxu1 %v2741_v45  ;;  %v2832_v43 = vld [vmem:[%s3307_s11 + $0x44c] ss:$16 sps:$4 sm:$0xff]   ;;  %v2827_v45 = vld [vmem:[%s3307_s11 + $0x248] ss:$16 sps:$4 sm:$0xff]  }
  0xd5   : > { %1581 = vmatpush1.bf16.msra.mxu0 %v2736_v46  ;;  %v2830_v46 = vld [vmem:[%s3307_s11 + $0x448] ss:$16 sps:$4 sm:$0xff]  }
  0xd6   : > { %1622 = vmatpush1.bf16.msra.mxu1 %v2739_v47  ;;  %1582 = vmatprep.subr.bf16.mxu0 %v2744_v48  ;;  %v2835_v47 = vld [vmem:[%s3307_s11 + $0x22c] ss:$16 sps:$4 sm:$0xff]  }
  0xd7   : > { %1623 = vmatprep.subr.bf16.mxu1 %v2747_v49  ;;  %v2838_v48 = vld [vmem:[%s3307_s11 + $0x42c] ss:$16 sps:$4 sm:$0xff]   ;;  %v2833_v49 = vld [vmem:[%s3307_s11 + $0x228] ss:$16 sps:$4 sm:$0xff]  }
  0xd9   : > { %1583 = vmatpush1.bf16.msra.mxu0 %v2742_v50  ;;  %v2836_v50 = vld [vmem:[%s3307_s11 + $0x428] ss:$16 sps:$4 sm:$0xff]  }
  0xda   : > { %1624 = vmatpush1.bf16.msra.mxu1 %v2745_v51  ;;  %1584 = vmatprep.subr.bf16.mxu0 %v2750_v52  ;;  %v2841_v51 = vld [vmem:[%s3307_s11 + $0x20c] ss:$16 sps:$4 sm:$0xff]  }
  0xdb   : > { %1625 = vmatprep.subr.bf16.mxu1 %v2753_v53  ;;  %v2844_v52 = vld [vmem:[%s3307_s11 + $0x40c] ss:$16 sps:$4 sm:$0xff]   ;;  %v2839_v53 = vld [vmem:[%s3307_s11 + $0x208] ss:$16 sps:$4 sm:$0xff]  }
  0xdd   : > { %1585 = vmatpush2.bf16.msra.mxu0 %v2748_v54  ;;  %v2842_v54 = vld [vmem:[%s3307_s11 + $0x408] ss:$16 sps:$4 sm:$0xff]  }
  0xde   : > { %1626 = vmatpush2.bf16.msra.mxu1 %v2751_v55  ;;  %1586 = vmatprep.subr.bf16.mxu0 %v2756_v56  ;;  %v2847_v55 = vld [vmem:[%s3307_s11 + $0x3ec] ss:$16 sps:$4 sm:$0xff]  }
  0xdf   : > { %1627 = vmatprep.subr.bf16.mxu1 %v2759_v57  ;;  %v2850_v56 = vld [vmem:[%s3307_s11 + $0x5ec] ss:$16 sps:$4 sm:$0xff]   ;;  %v2845_v57 = vld [vmem:[%s3307_s11 + $0x3e8] ss:$16 sps:$4 sm:$0xff]  }
  0xe1   : > { %1587 = vmatpush2.bf16.msra.mxu0 %v2754_v58  ;;  %v2848_v58 = vld [vmem:[%s3307_s11 + $0x5e8] ss:$16 sps:$4 sm:$0xff]  }
  0xe2   : > { %1628 = vmatpush2.bf16.msra.mxu1 %v2757_v59  ;;  %1588 = vmatprep.subr.bf16.mxu0 %v2762_v60  ;;  %v2853_v59 = vld [vmem:[%s3307_s11 + $0x3cc] ss:$16 sps:$4 sm:$0xff]  }
  0xe3   : > { %1629 = vmatprep.subr.bf16.mxu1 %v2765_v61  ;;  %v2856_v60 = vld [vmem:[%s3307_s11 + $0x5cc] ss:$16 sps:$4 sm:$0xff]   ;;  %v2851_v61 = vld [vmem:[%s3307_s11 + $0x3c8] ss:$16 sps:$4 sm:$0xff]  }
  0xe5   : > { %1589 = vmatpush2.bf16.msra.mxu0 %v2760_v62  ;;  %v2854_v62 = vld [vmem:[%s3307_s11 + $0x5c8] ss:$16 sps:$4 sm:$0xff]  }
  0xe6   : > { %1630 = vmatpush2.bf16.msra.mxu1 %v2763_v63  ;;  %1590 = vmatprep.subr.bf16.mxu0 %v2768_v1  ;;  %v2859_v63 = vld [vmem:[%s3307_s11 + $0x3ac] ss:$16 sps:$4 sm:$0xff]  }
  0xe7   : > { %1631 = vmatprep.subr.bf16.mxu1 %v2771_v2  ;;  %v2862_v1 = vld [vmem:[%s3307_s11 + $0x5ac] ss:$16 sps:$4 sm:$0xff]   ;;  %v2857_v2 = vld [vmem:[%s3307_s11 + $0x3a8] ss:$16 sps:$4 sm:$0xff]  }
  0xe9   : > { %1591 = vmatpush2.bf16.msra.mxu0 %v2766_v3  ;;  %v2860_v3 = vld [vmem:[%s3307_s11 + $0x5a8] ss:$16 sps:$4 sm:$0xff]  }
  0xea   : > { %1632 = vmatpush2.bf16.msra.mxu1 %v2769_v5  ;;  %1592 = vmatprep.subr.bf16.mxu0 %v2774_v6  ;;  %v2865_v5 = vld [vmem:[%s3307_s11 + $0x38c] ss:$16 sps:$4 sm:$0xff]  }
  0xeb   : > { %1633 = vmatprep.subr.bf16.mxu1 %v2777_v7  ;;  %v2868_v6 = vld [vmem:[%s3307_s11 + $0x58c] ss:$16 sps:$4 sm:$0xff]   ;;  %v2863_v7 = vld [vmem:[%s3307_s11 + $0x388] ss:$16 sps:$4 sm:$0xff]  }
  0xed   : > { %1593 = vmatpush2.bf16.msra.mxu0 %v2772_v8  ;;  %v2866_v8 = vld [vmem:[%s3307_s11 + $0x588] ss:$16 sps:$4 sm:$0xff]  }
  0xee   : > { %1634 = vmatpush2.bf16.msra.mxu1 %v2775_v9  ;;  %1594 = vmatprep.subr.bf16.mxu0 %v2780_v10  ;;  %v2871_v9 = vld [vmem:[%s3307_s11 + $0x36c] ss:$16 sps:$4 sm:$0xff]  }
  0xef   : > { %1635 = vmatprep.subr.bf16.mxu1 %v2783_v11  ;;  %v2874_v10 = vld [vmem:[%s3307_s11 + $0x56c] ss:$16 sps:$4 sm:$0xff]   ;;  %v2869_v11 = vld [vmem:[%s3307_s11 + $0x368] ss:$16 sps:$4 sm:$0xff]  }
  0xf1   : > { %1595 = vmatpush2.bf16.msra.mxu0 %v2778_v12  ;;  %v2872_v12 = vld [vmem:[%s3307_s11 + $0x568] ss:$16 sps:$4 sm:$0xff]  }
  0xf2   : > { %1636 = vmatpush2.bf16.msra.mxu1 %v2781_v13  ;;  %1596 = vmatprep.subr.bf16.mxu0 %v2786_v15  ;;  %v2877_v13 = vld [vmem:[%s3307_s11 + $0x34c] ss:$16 sps:$4 sm:$0xff]  }
  0xf3   : > { %1637 = vmatprep.subr.bf16.mxu1 %v2789_v16  ;;  %v2880_v15 = vld [vmem:[%s3307_s11 + $0x54c] ss:$16 sps:$4 sm:$0xff]   ;;  %v2875_v16 = vld [vmem:[%s3307_s11 + $0x348] ss:$16 sps:$4 sm:$0xff]  }
  0xf5   : > { %1597 = vmatpush2.bf16.msra.mxu0 %v2784_v17  ;;  %v2878_v17 = vld [vmem:[%s3307_s11 + $0x548] ss:$16 sps:$4 sm:$0xff]  }
  0xf6   : > { %1638 = vmatpush2.bf16.msra.mxu1 %v2787_v18  ;;  %1598 = vmatprep.subr.bf16.mxu0 %v2792_v20  ;;  %v2883_v18 = vld [vmem:[%s3307_s11 + $0x32c] ss:$16 sps:$4 sm:$0xff]  }
  0xf7   : > { %1639 = vmatprep.subr.bf16.mxu1 %v2795_v21  ;;  %v2886_v20 = vld [vmem:[%s3307_s11 + $0x52c] ss:$16 sps:$4 sm:$0xff]   ;;  %v2881_v21 = vld [vmem:[%s3307_s11 + $0x328] ss:$16 sps:$4 sm:$0xff]  }
  0xf9   : > { %1599 = vmatpush2.bf16.msra.mxu0 %v2790_v22  ;;  %v2884_v22 = vld [vmem:[%s3307_s11 + $0x528] ss:$16 sps:$4 sm:$0xff]  }
  0xfa   : > { %1640 = vmatpush2.bf16.msra.mxu1 %v2793_v23  ;;  %1650 = vmatprep.subr.bf16.mxu0 %v2799_v25  ;;  %v2889_v23 = vld [vmem:[%s3307_s11 + $0x30c] ss:$16 sps:$4 sm:$0xff]  }
  0xfb   : > { %1691 = vmatprep.subr.bf16.mxu1 %v2802_v26  ;;  %v2892_v25 = vld [vmem:[%s3307_s11 + $0x50c] ss:$16 sps:$4 sm:$0xff]   ;;  %v2887_v26 = vld [vmem:[%s3307_s11 + $0x308] ss:$16 sps:$4 sm:$0xff]  }
  0xfc   : > { %1601 = vmatmul.mubr.bf16.vlgmr.msra.gmra.mxu0 %v3384_v0 }
  0xfd   : > { %1642 = vmatmul.mubr.bf16.vlgmr.msra.gmra.mxu1 %v3402_v14  ;;  %1651 = vmatpush1.bf16.msra.mxu0 %v2797_v27  ;;  %v2809_v14 = vld [vmem:[%s3307_s11 + $0x2a8] ss:$16 sps:$4 sm:$0xff]  }
  0xfe   : > { %1692 = vmatpush1.bf16.msra.mxu1 %v2800_v28  ;;  %1652 = vmatprep.subr.bf16.mxu0 %v2805_v29  ;;  %v2890_v27 = vld [vmem:[%s3307_s11 + $0x508] ss:$16 sps:$4 sm:$0xff]  }
  0xff   : > { %1693 = vmatprep.subr.bf16.mxu1 %v2808_v30  ;;  %1682 = vmatprep.mubr.bf16.mxu0 %v3389_v4  ;;  %v2818_v4 = vld [vmem:[%s3307_s11 + $0x488] ss:$16 sps:$4 sm:$0xff]  }
 0x100   : > { %1723 = vmatprep.mubr.bf16.mxu1 %v3416_v24  ;;  %v2823_v24 = vld [vmem:[%s3307_s11 + $0x26c] ss:$16 sps:$4 sm:$0xff]  }
 0x101   : > { %1653 = vmatpush1.bf16.msra.mxu0 %v2803_v31 }
 0x102   : > { %1694 = vmatpush1.bf16.msra.mxu1 %v2806_v32  ;;  %1654 = vmatprep.subr.bf16.mxu0 %v2811_v33 }
 0x103   : > { %1695 = vmatprep.subr.bf16.mxu1 %v2814_v34 }
 0x105   : > { %1655 = vmatpush1.bf16.msra.mxu0 %v2809_v14 }
 0x106   : > { %1696 = vmatpush1.bf16.msra.mxu1 %v2812_v35  ;;  %1656 = vmatprep.subr.bf16.mxu0 %v2817_v36 }
 0x107   : > { %1697 = vmatprep.subr.bf16.mxu1 %v2820_v37 }
 0x109   : > { %1657 = vmatpush1.bf16.msra.mxu0 %v2815_v38 }
 0x10a   : > { %1698 = vmatpush1.bf16.msra.mxu1 %v2818_v4  ;;  %1658 = vmatprep.subr.bf16.mxu0 %v2823_v24 }
 0x10b   : > { %1699 = vmatprep.subr.bf16.mxu1 %v2826_v39 }
 0x10d   : > { %1659 = vmatpush1.bf16.msra.mxu0 %v2821_v40 }
 0x10e   : > { %1700 = vmatpush1.bf16.msra.mxu1 %v2824_v41  ;;  %1660 = vmatprep.subr.bf16.mxu0 %v2829_v42 }
 0x10f   : > { %1701 = vmatprep.subr.bf16.mxu1 %v2832_v43 }
 0x111   : > { %1661 = vmatpush1.bf16.msra.mxu0 %v2827_v45  ;;  %v3121_v45 = vmov 1983009808  }
 0x112   : > { %1702 = vmatpush1.bf16.msra.mxu1 %v2830_v46  ;;  %1662 = vmatprep.subr.bf16.mxu0 %v2835_v47  ;;  %v1739_v46 = vunpack.c.l.s4 %v3121_v45 }
 0x113   : > { %1703 = vmatprep.subr.bf16.mxu1 %v2838_v48 }
 0x115   : > { %1663 = vmatpush1.bf16.msra.mxu0 %v2833_v49  ;;  %v1740_v49 = vunpack.c.0.s8 %v1739_v46 }
 0x116   : > { %1704 = vmatpush1.bf16.msra.mxu1 %v2836_v50  ;;  %1664 = vmatprep.subr.bf16.mxu0 %v2841_v51 }
 0x117   : > { %1705 = vmatprep.subr.bf16.mxu1 %v2844_v52 }
 0x119   : > { %1665 = vmatpush1.bf16.msra.mxu0 %v2839_v53 }
 0x11a   : > { %1706 = vmatpush1.bf16.msra.mxu1 %v2842_v54  ;;  %1666 = vmatprep.subr.bf16.mxu0 %v2847_v55 }
 0x11b   : > { %1707 = vmatprep.subr.bf16.mxu1 %v2850_v56  ;;  %v3550_v56 = vsub.s32 %v1740_v49, %v3362_v44 }
 0x11d   : > { %1667 = vmatpush2.bf16.msra.mxu0 %v2845_v57 }
 0x11e   : > { %1708 = vmatpush2.bf16.msra.mxu1 %v2848_v58  ;;  %1668 = vmatprep.subr.bf16.mxu0 %v2853_v59 }
 0x11f   : > { %1709 = vmatprep.subr.bf16.mxu1 %v2856_v60 }
 0x121   : > { %1669 = vmatpush2.bf16.msra.mxu0 %v2851_v61 }
 0x122   : > { %1710 = vmatpush2.bf16.msra.mxu1 %v2854_v62  ;;  %1670 = vmatprep.subr.bf16.mxu0 %v2859_v63 }
 0x123   : > { %1711 = vmatprep.subr.bf16.mxu1 %v2862_v1  ;;  %v278_v1 = vld [vmem:[#allocation2] sm:$0xff] }
 0x125   : > { %1671 = vmatpush2.bf16.msra.mxu0 %v2857_v2 }
 0x126   : > { %1712 = vmatpush2.bf16.msra.mxu1 %v2860_v3  ;;  %1672 = vmatprep.subr.bf16.mxu0 %v2865_v5 }
 0x127   : > { %1713 = vmatprep.subr.bf16.mxu1 %v2868_v6 }
 0x129   : > { %1673 = vmatpush2.bf16.msra.mxu0 %v2863_v7 }
 0x12a   : > { %1714 = vmatpush2.bf16.msra.mxu1 %v2866_v8  ;;  %1674 = vmatprep.subr.bf16.mxu0 %v2871_v9 }
 0x12b   : > { %1715 = vmatprep.subr.bf16.mxu1 %v2874_v10 }
 0x12d   : > { %1675 = vmatpush2.bf16.msra.mxu0 %v2869_v11 }
 0x12e   : > { %1716 = vmatpush2.bf16.msra.mxu1 %v2872_v12  ;;  %1676 = vmatprep.subr.bf16.mxu0 %v2877_v13 }
 0x12f   : > { %1717 = vmatprep.subr.bf16.mxu1 %v2880_v15 }
 0x131   : > { %1677 = vmatpush2.bf16.msra.mxu0 %v2875_v16 }
 0x132   : > { %1718 = vmatpush2.bf16.msra.mxu1 %v2878_v17  ;;  %1678 = vmatprep.subr.bf16.mxu0 %v2883_v18 }
 0x133   : > { %1719 = vmatprep.subr.bf16.mxu1 %v2886_v20 }
 0x135   : > { %1679 = vmatpush2.bf16.msra.mxu0 %v2881_v21 }
 0x136   : > { %1720 = vmatpush2.bf16.msra.mxu1 %v2884_v22  ;;  %1680 = vmatprep.subr.bf16.mxu0 %v2889_v23 }
 0x137   : > { %1721 = vmatprep.subr.bf16.mxu1 %v2892_v25 }
 0x139   : > { %1681 = vmatpush2.bf16.msra.mxu0 %v2887_v26 }
 0x13a   : > { %1722 = vmatpush2.bf16.msra.mxu1 %v2890_v27 }
 0x13c   : > { %1683 = vmatmul.mubr.bf16.vlgmr.msra.gmra.mxu0 %v3409_v19 }
 0x13d   : > { %1724 = vmatmul.mubr.bf16.vlgmr.msra.gmra.mxu1 %v3384_v0 }
 0x17c   : > { %v1520_v28 = vpop.f32.mrf.mxu0 }
 0x17d   : > { %v1561_v29 = vpop.f32.mrf.mxu1 }
 0x17e   : > { %v1562_v30 = vadd.f32 %v1561_v29, %v1520_v28  ;;  %v1522_v31 = vpop.f32.mrf.mxu0 }
 0x17f   : > { %v1563_v32 = vpop.f32.mrf.mxu1 }
 0x180   : > { %v1564_v33 = vadd.f32 %v1563_v32, %v1522_v31  ;;  %v1524_v34 = vpop.f32.mrf.mxu0 }
 0x181   : > { %v1565_v14 = vpop.f32.mrf.mxu1 }
 0x182   : > { %v1525_v35 = vpop.f32.mrf.mxu0 }
 0x183   : > { %v1566_v36 = vpop.f32.mrf.mxu1 }
 0x1bc   : > { %v1602_v37 = vpop.f32.mrf.mxu0 }
 0x1bd   : > { %v1643_v38 = vpop.f32.mrf.mxu1  ;;  %v1603_v4 = vadd.f32 %v1602_v37, %v1562_v30 }
 0x1be   : > { %v1604_v24 = vpop.f32.mrf.mxu0 }
 0x1bf   : > { %v1645_v39 = vpop.f32.mrf.mxu1  ;;  %v1605_v40 = vadd.f32 %v1604_v24, %v1564_v33 }
 0x1c0   : > { %v1606_v41 = vpop.f32.mrf.mxu0 }
 0x1c1   : > { %v1647_v19 = vpop.f32.mrf.mxu1  ;;  %v1736_v42 = vcombine.low %v1603_v4, %v1605_v40 }
 0x1c2   : > { %v1607_v0 = vpop.f32.mrf.mxu0 }
 0x1c3   : > { %v1648_v43 = vpop.f32.mrf.mxu1  ;;  %v1744_v62 = vrot.slane %v1736_v42, %v3550_v56 }
 0x1fc   : > { %v1684_v47 = vpop.f32.mrf.mxu0 }
 0x1fd   : > { %v1725_v48 = vpop.f32.mrf.mxu1  ;;  %v1685_v50 = vadd.f32 %v1684_v47, %v1643_v38 }
 0x1fe   : > { %v1686_v51 = vpop.f32.mrf.mxu0 }
 0x1ff   : > { %v1727_v52 = vpop.f32.mrf.mxu1  ;;  %v1687_v53 = vadd.f32 %v1686_v51, %v1645_v39  ;;  %v1726_v57 = vadd.f32 %v1725_v48, %v1685_v50 }
 0x200   : > { %v1688_v54 = vpop.f32.mrf.mxu0 }
 0x201   : > { %v1729_v55 = vpop.f32.mrf.mxu1  ;;  %v1728_v58 = vadd.f32 %v1727_v52, %v1687_v53 }
 0x202   : > { %v1689_v59 = vpop.f32.mrf.mxu0 }
 0x203   : > { %v1730_v60 = vpop.f32.mrf.mxu1  ;;  %v1737_v61 = vcombine.low %v1726_v57, %v1728_v58 }
 0x205   : > { %v1751_v63 = vrot.slane %v1737_v61, %v3550_v56 }
 0x207   : > { %v1752_v2 = vcombine.low %v1744_v62, %v1751_v63  ;;  %1759 = sbr.rel (%p2435_p2) target bundleno = 760 (0x2f8), region = 60 }
 0x209   : > { %v1754_v3 = vadd.f32 %v1752_v2, %v278_v1 }
 0x20b   : > { %1755 = vst [vmem:[#allocation2] sm:$0xff] %v1754_v3 }
 0x20c   : > { %v2893_v5 = vld [vmem:[#allocation8 + $0x78] sm:$0xff]   ;;  %v2897_v8 = vld [vmem:[#allocation8 + $0x70] sm:$0xff]   ;;  %v2901_v12 = vld [vmem:[#allocation8 + $0x68] sm:$0xff]  }
 0x20d   : > { %v2894_v6 = vld [vmem:[#allocation8 + $0xf8] sm:$0xff]   ;;  %2477 = vmatprep.subr.bf16.mxu0 %v2893_v5  ;;  %v2898_v9 = vld [vmem:[#allocation8 + $0xf0] sm:$0xff]   ;;  %v2902_v13 = vld [vmem:[#allocation8 + $0xe8] sm:$0xff]  }
 0x20e   : > { %v2895_v44 = vld [vmem:[#allocation8 + $0x38] sm:$0xff]   ;;  %2499 = vmatprep.subr.bf16.mxu1 %v2894_v6  ;;  %v2899_v10 = vld [vmem:[#allocation8 + $0x30] sm:$0xff]   ;;  %v2903_v15 = vld [vmem:[#allocation8 + $0x28] sm:$0xff]  }
 0x20f   : > { %v2896_v7 = vld [vmem:[#allocation8 + $0xb8] sm:$0xff]   ;;  %2478 = vmatpush3.bf16.msra.mxu0 %v2895_v44  ;;  %v2900_v11 = vld [vmem:[#allocation8 + $0xb0] sm:$0xff]   ;;  %v2904_v16 = vld [vmem:[#allocation8 + $0xa8] sm:$0xff]  }
 0x210   : > { %2500 = vmatpush3.bf16.msra.mxu1 %v2896_v7  ;;  %2479 = vmatprep.subr.bf16.mxu0 %v2897_v8  ;;  %v2905_v17 = vld [vmem:[#allocation8 + $0x60] sm:$0xff]   ;;  %v2909_v22 = vld [vmem:[#allocation8 + $0x58] sm:$0xff]   ;;  %v2913_v27 = vld [vmem:[#allocation8 + $0x50] sm:$0xff]  }
 0x211   : > { %2501 = vmatprep.subr.bf16.mxu1 %v2898_v9  ;;  %v2906_v18 = vld [vmem:[#allocation8 + $0xe0] sm:$0xff]   ;;  %v2910_v23 = vld [vmem:[#allocation8 + $0xd8] sm:$0xff]   ;;  %v2914_v28 = vld [vmem:[#allocation8 + $0xd0] sm:$0xff]  }
 0x212   : > { %v2907_v20 = vld [vmem:[#allocation8 + $0x20] sm:$0xff]   ;;  %v2911_v25 = vld [vmem:[#allocation8 + $0x18] sm:$0xff]   ;;  %v2915_v29 = vld [vmem:[#allocation8 + $0x10] sm:$0xff]  }
 0x213   : > { %2480 = vmatpush3.bf16.msra.mxu0 %v2899_v10  ;;  %v2908_v21 = vld [vmem:[#allocation8 + $0xa0] sm:$0xff]   ;;  %v2912_v26 = vld [vmem:[#allocation8 + $0x98] sm:$0xff]   ;;  %v2916_v30 = vld [vmem:[#allocation8 + $0x90] sm:$0xff]  }
 0x214   : > { %2502 = vmatpush3.bf16.msra.mxu1 %v2900_v11  ;;  %2481 = vmatprep.subr.bf16.mxu0 %v2901_v12  ;;  %v2917_v31 = vld [vmem:[#allocation8 + $0x48] sm:$0xff]   ;;  %v2921_v14 = vld [vmem:[#allocation8 + $0x40] sm:$0xff]  }
 0x215   : > { %2503 = vmatprep.subr.bf16.mxu1 %v2902_v13  ;;  %v2918_v32 = vld [vmem:[#allocation8 + $0xc8] sm:$0xff]   ;;  %v2922_v35 = vld [vmem:[#allocation8 + $0xc0] sm:$0xff]  }
 0x216   : > { %v2919_v33 = vld [vmem:[#allocation8 + $0x8] sm:$0xff]   ;;  %v2923_v36 = vld [vmem:[#allocation8] sm:$0xff]  }
 0x217   : > { %2482 = vmatpush3.bf16.msra.mxu0 %v2903_v15  ;;  %v2920_v34 = vld [vmem:[#allocation8 + $0x88] sm:$0xff]   ;;  %v2924_v37 = vld [vmem:[#allocation8 + $0x80] sm:$0xff]  }
 0x218   : > { %2504 = vmatpush3.bf16.msra.mxu1 %v2904_v16  ;;  %2483 = vmatprep.subr.bf16.mxu0 %v2905_v17  ;;  %v1760_v38 = vld [vmem:[#allocation2] sm:$0xff]  ;;  %v2436_v48 = vld [vmem:[#allocation9] ss:$0 sm:$0xff] }
 0x219   : > { %2505 = vmatprep.subr.bf16.mxu1 %v2906_v18  ;;  %2925 = vtanh.f32 %v1760_v38 }
 0x21b   : > { %2484 = vmatpush3.bf16.msra.mxu0 %v2907_v20 }
 0x21c   : > { %2506 = vmatpush3.bf16.msra.mxu1 %v2908_v21  ;;  %2485 = vmatprep.subr.bf16.mxu0 %v2909_v22 }
 0x21d   : > { %2507 = vmatprep.subr.bf16.mxu1 %v2910_v23 }
 0x21f   : > { %2486 = vmatpush3.bf16.msra.mxu0 %v2911_v25 }
 0x220   : > { %2508 = vmatpush3.bf16.msra.mxu1 %v2912_v26  ;;  %2487 = vmatprep.subr.bf16.mxu0 %v2913_v27 }
 0x221   : > { %2509 = vmatprep.subr.bf16.mxu1 %v2914_v28 }
 0x223   : > { %2488 = vmatpush3.bf16.msra.mxu0 %v2915_v29 }
 0x224   : > { %2510 = vmatpush3.bf16.msra.mxu1 %v2916_v30  ;;  %2489 = vmatprep.subr.bf16.mxu0 %v2917_v31 }
 0x225   : > { %2511 = vmatprep.subr.bf16.mxu1 %v2918_v32 }
 0x226   : > { %v2926_v4 = vpop.eup %2925 }
 0x227   : > { %2490 = vmatpush3.bf16.msra.mxu0 %v2919_v33  ;;  %v1770_v24 = vrot.slane %v2926_v4, %v3550_v56  ;;  %v1763_v39 = vcombine.high %v2926_v4, %v2926_v4 }
 0x228   : > { %2512 = vmatpush3.bf16.msra.mxu1 %v2920_v34  ;;  %2491 = vmatprep.subr.bf16.mxu0 %v2921_v14 }
 0x229   : > { %2513 = vmatprep.subr.bf16.mxu1 %v2922_v35  ;;  %v1778_v40 = vcombine.high %v1770_v24, %v1770_v24  ;;  %v1777_v41 = vrot.slane %v1763_v39, %v3550_v56  ;;  %v1784_v19 = vpack.c.bf16 %v1770_v24, %v1770_v24 }
 0x22b   : > { %2492 = vmatpush3.bf16.msra.mxu0 %v2923_v36  ;;  %v1785_v42 = vpack.c.bf16 %v1778_v40, %v1778_v40  ;;  %v1779_v0 = vcombine.high %v1777_v41, %v1777_v41  ;;  %v1786_v43 = vpack.c.bf16 %v1777_v41, %v1777_v41 }
 0x22c   : > { %2514 = vmatpush3.bf16.msra.mxu1 %v2924_v37 }
 0x22d   : > { %2083 = vmatprep.mubr.bf16.mxu0 %v1785_v42  ;;  %v1787_v45 = vpack.c.bf16 %v1779_v0, %v1779_v0 }
 0x22e   : > { %2084 = vmatmul.mubr.bf16.vlgmr.msra.gmra.mxu0 %v1784_v19 }
 0x22f   : > { %2123 = vmatprep.mubr.bf16.mxu1 %v1787_v45 }
 0x230   : > { %2124 = vmatmul.mubr.bf16.vlgmr.msra.gmra.mxu1 %v1786_v43 }
 0x2ee   : > { %v2493_v46 = vpop.f32.mrf.mxu0 }
 0x2f0   : > { %v2515_v47 = vpop.f32.mrf.mxu1  ;;  %v2494_v49 = vpop.f32.mrf.mxu0 }
 0x2f1   : > { %v2495_v50 = vadd.f32 %v2494_v49, %v2493_v46 }
 0x2f2   : > { %v2516_v51 = vpop.f32.mrf.mxu1  ;;  %v2496_v52 = vpop.f32.mrf.mxu0 }
 0x2f3   : > { %v2086_v53 = vadd.f32 %v2495_v50, %v2436_v48  ;;  %v2517_v54 = vadd.f32 %v2516_v51, %v2515_v47 }
 0x2f4   : > { %v2518_v55 = vpop.f32.mrf.mxu1  ;;  %v2497_v56 = vpop.f32.mrf.mxu0 }
 0x2f5   : > { %v2126_v57 = vadd.f32 %v2517_v54, %v2086_v53 }
 0x2f6   : > { %v2519_v58 = vpop.f32.mrf.mxu1 }
 0x2f7   : > { %2131 = vst [vmem:[#allocation11] sm:$0x3] %v2126_v57 }
 0x2f8 PF: > { %p2560_p3 = scmp.eq.s32.totalorder %s3167_s19, 2  ;;  %s3122_s20 = smov [#allocation11]  }
 0x2f9   : > { %s2139_s21 = sshll.u32 %s3122_s20, 4  ;;  %s2140_s21 = int_to_ptr.vmem [resolvable:$true] %s2139_s21 }
 0x2fa   : > { %s3035_s12 = scalar_lea.vmem %s2140_s21, 32  ;;  %p3042_p1 = scmp.lt.s32.totalorder %s2140_s21, %s2140_s21 }
 0x2fb   : > { %p3036_p7 = scmp.ne.s32.totalorder %s2140_s21, %s3035_s12  ;;  %p3043_p5 = scmp.lt.s32.totalorder %s3035_s12, %s3035_s12 }
 0x2fd   : > { %p3037_p10 = pnand %p3036_p7, %p2560_p3  ;;  %p3044_p11 = por %p3043_p5, %p3042_p1 }
 0x2ff   : > { %p3038_p13 = pneg %p3037_p10 }
 0x301   : > { %p3045_p6 = pnand %p3044_p11, %p3038_p13 }
 0x303   : > { %3048 = shalt.err (!%p3045_p6)
}
 0x304   : > { %2538 = dma.vmem_to_hbm [thread:$0]  (%p2560_p3), %s2140_s21, 32, %s3586_s4, [#allocation5]  }
 0x305   : > { %3092 = dma.done.wait (%p2560_p3), [#allocation5], 32  }
 0x306   : > { %3094 = vsyncadd (%p2560_p3), [#allocation5], 4294967264 }
 0x307 PF: > { %p19_p8 = scmp.ge.s32.totalorder %s3211_s10, 5   ;;  %s3601_s15 = smov %s3101_s16 }
 0x308   : > { %s3602_s16 = smov %s3105_s17  ;;  %s3603_s17 = smov %s3224_s14 }
 0x309   : > { %s3604_s18 = smov %s3211_s10  ;;  %21 = sbr.rel (!%p19_p8) target bundleno = 7 (0x7), region = 102 }
 0x30e   :  { %2152 = vsyncpa [#allocation4], 1 }
 0x30f   :  { %2154 = vsyncpa [#allocation4 + $0x1], 1 }
 0x310   :  { %2155 = vsyncpa [#allocation7], 1 }
 0x311   :  { %2157 = vsyncpa [#allocation7 + $0x1], 1 }
 0x312   :  { %2158 = vsyncpa [#allocation10], 1 }
 0x313   :  { %2159 = vsyncpa [#allocation5], 1 }
 0x314   :  { %2161 = vsyncpa [#allocation5 + $0x1], 1 }

</bundles_post_ra>
